<compile_context>
chip_gen: v7x
topology: tpu7x:2x2x1
jax: 0.10.0
libtpu: 0.0.40
codegen_flags: <defaults>
</compile_context>

<pallas_src>
import functools

import jax
import jax.numpy as jnp
from jax.experimental import pallas as pl
from jax.experimental.pallas import tpu as pltpu


def _convlstm_kernel(p_ref, c_ref, w_ref, h_out_ref, c_out_ref, *, HD):
    """Single grid step covering the whole batch.

    p_ref     : (Kpad, B*HW)   im2col patches (+ ones row for bias, zero pad)
    c_ref     : (HD,   B*HW)   current cell state
    w_ref     : (4*HD, Kpad)   conv weight (+ bias column, zero pad)
    h_out_ref : (HD,   B*HW)
    c_out_ref : (HD,   B*HW)
    """
    # One MXU matmul for all conv taps, all batches, bias included.
    # bf16 x bf16 -> f32 accumulation.
    pre = jnp.dot(w_ref[...], p_ref[...], preferred_element_type=jnp.float32)

    # Gate split along sublanes at 8-aligned offsets (free vreg selects).
    cc_i = pre[0 * HD:1 * HD]
    cc_f = pre[1 * HD:2 * HD]
    cc_o = pre[2 * HD:3 * HD]
    cc_g = pre[3 * HD:4 * HD]

    i = jax.nn.sigmoid(cc_i)
    f = jax.nn.sigmoid(cc_f)
    o = jax.nn.sigmoid(cc_o)
    g = jnp.tanh(cc_g)

    c_cur = c_ref[...].astype(jnp.float32)
    c_next = f * c_cur + i * g
    h_next = o * jnp.tanh(c_next)

    h_out_ref[...] = h_next.astype(h_out_ref.dtype)
    c_out_ref[...] = c_next.astype(c_out_ref.dtype)


def conv_lstm_cell(x_nchw, h_nchw, c_nchw, weight_oihw, bias, kernel_size,
                   *, matmul_dtype=jnp.bfloat16):
    """ConvLSTMCell.forward.  Inputs/outputs are NCHW to match PyTorch."""
    KH, KW = kernel_size
    pad_h, pad_w = KH // 2, KW // 2

    B, Cx, H, W = x_nchw.shape
    HD = c_nchw.shape[1]
    Cin = Cx + HD
    HW = H * W
    BHW = B * HW
    K = Cin * KH * KW                       # true contraction length (108)
    Kpad = max(128, ((K + 1 + 127) // 128) * 128)   # bias row + pad to 128

    # Channels-first im2col in the wrapper; k index = ci*KH*KW + kh*KW + kw
    # (matches the plain OIHW weight reshape).  Lane index = b*HW + h*W + w.
    combined = jnp.concatenate([x_nchw, h_nchw], axis=1)          # (B, Cin, H, W)
    combined_p = jnp.pad(combined,
                         ((0, 0), (0, 0), (pad_h, pad_h), (pad_w, pad_w)))
    patches = jnp.stack(
        [combined_p[:, :, kh:kh + H, kw:kw + W]
         for kh in range(KH) for kw in range(KW)],
        axis=2)                                                   # (B, Cin, KH*KW, H, W)
    patches = patches.transpose(1, 2, 0, 3, 4).reshape(K, BHW)    # (K, B*HW)
    # Bias-fold (ones row) + zero padding up to Kpad: padded rows are exactly
    # zero so they contribute nothing to the contraction.
    patches = jnp.concatenate(
        [patches,
         jnp.ones((1, BHW), patches.dtype),
         jnp.zeros((Kpad - K - 1, BHW), patches.dtype)], axis=0)  # (Kpad, B*HW)

    w2 = weight_oihw.reshape(4 * HD, K)
    w2 = jnp.concatenate(
        [w2,
         bias.reshape(4 * HD, 1),
         jnp.zeros((4 * HD, Kpad - K - 1), w2.dtype)], axis=1)    # (4*HD, Kpad)

    # bf16 operands, f32 accumulation (set matmul_dtype=jnp.float32 for exact).
    patches = patches.astype(matmul_dtype)
    w2 = w2.astype(matmul_dtype)

    c_flat = c_nchw.transpose(1, 0, 2, 3).reshape(HD, BHW)        # (HD, B*HW)

    kernel = functools.partial(_convlstm_kernel, HD=HD)

    h_next, c_next = pl.pallas_call(
        kernel,
        out_shape=(
            jax.ShapeDtypeStruct((HD, BHW), x_nchw.dtype),
            jax.ShapeDtypeStruct((HD, BHW), c_nchw.dtype),   # keep c in its own dtype
        ),
        grid_spec=pltpu.PrefetchScalarGridSpec(
            num_scalar_prefetch=0,
            grid=(1,),                                       # single step: no per-batch overhead
            in_specs=[
                pl.BlockSpec((Kpad, BHW), lambda i: (0, 0)),      # patches
                pl.BlockSpec((HD, BHW), lambda i: (0, 0)),        # c_cur
                pl.BlockSpec((4 * HD, Kpad), lambda i: (0, 0)),   # weight (+bias col)
            ],
            out_specs=[
                pl.BlockSpec((HD, BHW), lambda i: (0, 0)),
                pl.BlockSpec((HD, BHW), lambda i: (0, 0)),
            ],
        ),
        compiler_params=pltpu.CompilerParams(
            dimension_semantics=("arbitrary",)),
    )(patches, c_flat, w2)

    # (HD, B*HW) -> (B, HD, H, W)
    h_out = h_next.reshape(HD, B, H, W).transpose(1, 0, 2, 3)
    c_out = c_next.reshape(HD, B, H, W).transpose(1, 0, 2, 3)
    return h_out, c_out


def _reference(x, h, c, w_oihw, bias, kernel_size):
    """Pure-JAX f32 reference matching the PyTorch forward exactly (NCHW)."""
    KH, KW = kernel_size
    combined = jnp.concatenate([x, h], axis=1)
    conv = jax.lax.conv_general_dilated(
        combined, w_oihw, window_strides=(1, 1),
        padding=((KH // 2, KH // 2), (KW // 2, KW // 2)),
        dimension_numbers=("NCHW", "OIHW", "NCHW"))
    conv = conv + bias[None, :, None, None]
    HD = c.shape[1]
    cc_i, cc_f, cc_o, cc_g = (conv[:, k * HD:(k + 1) * HD] for k in range(4))
    i = jax.nn.sigmoid(cc_i)
    f = jax.nn.sigmoid(cc_f)
    o = jax.nn.sigmoid(cc_o)
    g = jnp.tanh(cc_g)
    c_next = f * c + i * g
    h_next = o * jnp.tanh(c_next)
    return h_next, c_next


if __name__ == "__main__":
    # Module config: input_size=(16,16), input_dim=4, hidden_dim=8, kernel=(3,3)
    B, CIN, H, W = 2, 4, 16, 16
    HD = 8
    KS = (3, 3)

    key = jax.random.PRNGKey(0)
    kx, kh, kc, kw_, kb = jax.random.split(key, 5)

    x = jax.random.normal(kx, (B, CIN, H, W), jnp.float32)
    h_cur = jax.random.normal(kh, (B, HD, H, W), jnp.float32)
    c_cur = jax.random.normal(kc, (B, HD, H, W), jnp.float32)

    # Synthetic conv params (shapes from nn.Conv2d in __init__):
    # weight: (4*hidden_dim, input_dim + hidden_dim, KH, KW), bias: (4*hidden_dim,)
    w = 0.1 * jax.random.normal(kw_, (4 * HD, CIN + HD, KS[0], KS[1]), jnp.float32)
    b = 0.1 * jax.random.normal(kb, (4 * HD,), jnp.float32)

    h_ref, c_ref = _reference(x, h_cur, c_cur, w, b, KS)

    # Exactness check: f32 matmul path must match the reference tightly.
    h_f32, c_f32 = conv_lstm_cell(x, h_cur, c_cur, w, b, KS,
                                  matmul_dtype=jnp.float32)
    jax.block_until_ready((h_f32, c_f32))
    assert jnp.allclose(h_f32, h_ref, atol=1e-5, rtol=1e-5)
    assert jnp.allclose(c_f32, c_ref, atol=1e-5, rtol=1e-5)

    # Default fast path: bf16 operands, f32 accumulation (quantization-level tol).
    h_next, c_next = conv_lstm_cell(x, h_cur, c_cur, w, b, KS)
    jax.block_until_ready((h_next, c_next))
    assert jnp.allclose(h_next, h_ref, atol=2e-2, rtol=2e-2)
    assert jnp.allclose(c_next, c_ref, atol=2e-2, rtol=2e-2)

    print("KERNEL_OK")
</pallas_src>

<mosaic_0001>
module attributes {stable_mosaic.version = 11 : i64} {
  func.func @_convlstm_kernel(%arg0: i32, %arg1: memref<128x512xf32, #tpu.memory_space<vmem>>, %arg2: memref<8x512xf32, #tpu.memory_space<vmem>>, %arg3: memref<32x128xf32, #tpu.memory_space<vmem>>, %arg4: memref<8x512xf32, #tpu.memory_space<vmem>>, %arg5: memref<8x512xf32, #tpu.memory_space<vmem>>) attributes {dimension_semantics = [#tpu.dimension_semantics<arbitrary>], iteration_bounds = array<i64: 1>, scalar_prefetch = 0 : i64, scratch_operands = 0 : i64, tpu.core_type = #tpu.core_type<tc>, window_params = [{pipeline_mode = #tpu.pipeline_mode<synchronous>, transform_indices = @transform_0, window_bounds = array<i64: 128, 512>}, {pipeline_mode = #tpu.pipeline_mode<synchronous>, transform_indices = @transform_1, window_bounds = array<i64: 8, 512>}, {pipeline_mode = #tpu.pipeline_mode<synchronous>, transform_indices = @transform_2, window_bounds = array<i64: 32, 128>}, {pipeline_mode = #tpu.pipeline_mode<synchronous>, transform_indices = @transform_3, window_bounds = array<i64: 8, 512>}, {pipeline_mode = #tpu.pipeline_mode<synchronous>, transform_indices = @transform_4, window_bounds = array<i64: 8, 512>}]} {
    %c0 = arith.constant 0 : index
    %c0_0 = arith.constant 0 : index
    %0 = vector.load %arg3[%c0, %c0_0] : memref<32x128xf32, #tpu.memory_space<vmem>>, vector<32x128xf32>
    %c0_1 = arith.constant 0 : index
    %c0_2 = arith.constant 0 : index
    %1 = vector.load %arg1[%c0_1, %c0_2] : memref<128x512xf32, #tpu.memory_space<vmem>>, vector<128x512xf32>
    %cst = arith.constant dense<0.000000e+00> : vector<32x512xf32>
    %2 = tpu.matmul %0, %1, %cst {dimension_numbers = #tpu.dot_dimension_numbers<[1], [0], [0], [1], [0, 0, 1, 1], [], []>} : vector<32x128xf32>, vector<128x512xf32>, vector<32x512xf32> -> vector<32x512xf32>
    %3 = vector.extract_strided_slice %2 {offsets = [0, 0], sizes = [8, 512], strides = [1, 1]} : vector<32x512xf32> to vector<8x512xf32>
    %4 = vector.extract_strided_slice %2 {offsets = [8, 0], sizes = [8, 512], strides = [1, 1]} : vector<32x512xf32> to vector<8x512xf32>
    %5 = vector.extract_strided_slice %2 {offsets = [16, 0], sizes = [8, 512], strides = [1, 1]} : vector<32x512xf32> to vector<8x512xf32>
    %6 = vector.extract_strided_slice %2 {offsets = [24, 0], sizes = [8, 512], strides = [1, 1]} : vector<32x512xf32> to vector<8x512xf32>
    %7 = arith.negf %3 : vector<8x512xf32>
    %8 = math.exp %7 : vector<8x512xf32>
    %cst_3 = arith.constant 1.000000e+00 : f32
    %9 = vector.broadcast %cst_3 : f32 to vector<8x512xf32>
    %10 = arith.addf %9, %8 : vector<8x512xf32>
    %11 = arith.divf %9, %10 : vector<8x512xf32>
    %12 = arith.negf %4 : vector<8x512xf32>
    %13 = math.exp %12 : vector<8x512xf32>
    %cst_4 = arith.constant 1.000000e+00 : f32
    %14 = vector.broadcast %cst_4 : f32 to vector<8x512xf32>
    %15 = arith.addf %14, %13 : vector<8x512xf32>
    %16 = arith.divf %14, %15 : vector<8x512xf32>
    %17 = arith.negf %5 : vector<8x512xf32>
    %18 = math.exp %17 : vector<8x512xf32>
    %cst_5 = arith.constant 1.000000e+00 : f32
    %19 = vector.broadcast %cst_5 : f32 to vector<8x512xf32>
    %20 = arith.addf %19, %18 : vector<8x512xf32>
    %21 = arith.divf %19, %20 : vector<8x512xf32>
    %22 = math.tanh %6 : vector<8x512xf32>
    %c0_6 = arith.constant 0 : index
    %c0_7 = arith.constant 0 : index
    %23 = vector.load %arg2[%c0_6, %c0_7] : memref<8x512xf32, #tpu.memory_space<vmem>>, vector<8x512xf32>
    %24 = arith.mulf %16, %23 : vector<8x512xf32>
    %25 = arith.mulf %11, %22 : vector<8x512xf32>
    %26 = arith.addf %24, %25 : vector<8x512xf32>
    %27 = math.tanh %26 : vector<8x512xf32>
    %28 = arith.mulf %21, %27 : vector<8x512xf32>
    %c0_8 = arith.constant 0 : index
    %c0_9 = arith.constant 0 : index
    %29 = vector.load %arg4[%c0_8, %c0_9] : memref<8x512xf32, #tpu.memory_space<vmem>>, vector<8x512xf32>
    tpu.vector_store %arg4[%c0_8, %c0_9], %28 {strides = array<i32>} : memref<8x512xf32, #tpu.memory_space<vmem>>, vector<8x512xf32>,
    %c0_10 = arith.constant 0 : index
    %c0_11 = arith.constant 0 : index
    %30 = vector.load %arg5[%c0_10, %c0_11] : memref<8x512xf32, #tpu.memory_space<vmem>>, vector<8x512xf32>
    tpu.vector_store %arg5[%c0_10, %c0_11], %26 {strides = array<i32>} : memref<8x512xf32, #tpu.memory_space<vmem>>, vector<8x512xf32>,
    return
  }
  func.func @transform_0(%arg0: i32) -> (i32, i32) {
    %c0_i32 = arith.constant 0 : i32
    %c0_i32_0 = arith.constant 0 : i32
    %c0_i32_1 = arith.constant 0 : i32
    return %c0_i32, %c0_i32_0 : i32, i32
  }
  func.func @transform_1(%arg0: i32) -> (i32, i32) {
    %c0_i32 = arith.constant 0 : i32
    %c0_i32_0 = arith.constant 0 : i32
    %c0_i32_1 = arith.constant 0 : i32
    return %c0_i32, %c0_i32_0 : i32, i32
  }
  func.func @transform_2(%arg0: i32) -> (i32, i32) {
    %c0_i32 = arith.constant 0 : i32
    %c0_i32_0 = arith.constant 0 : i32
    %c0_i32_1 = arith.constant 0 : i32
    return %c0_i32, %c0_i32_0 : i32, i32
  }
  func.func @transform_3(%arg0: i32) -> (i32, i32) {
    %c0_i32 = arith.constant 0 : i32
    %c0_i32_0 = arith.constant 0 : i32
    %c0_i32_1 = arith.constant 0 : i32
    return %c0_i32, %c0_i32_0 : i32, i32
  }
  func.func @transform_4(%arg0: i32) -> (i32, i32) {
    %c0_i32 = arith.constant 0 : i32
    %c0_i32_0 = arith.constant 0 : i32
    %c0_i32_1 = arith.constant 0 : i32
    return %c0_i32, %c0_i32_0 : i32, i32
  }
}

</mosaic_0001>

<bundles_post_ra>
// kernel: tpu_custom_call.1
= control target key start
LH: loop header
LB: loop body
LE: loop exit
PB: predicated region body
PF: predicated region fallthrough
CT: control target
= control target key end

     0   :  { %10 = vsyncpa [#allocation3], 0  ;;  %s819_s0 = inlined_call_operand.hbm [shape: f32[128,512], index: 0, kind: input, shape index: {}]   ;;  %s820_s1 = inlined_call_operand.hbm [shape: f32[8,512], index: 1, kind: input, shape index: {}]   ;;  %s821_s2 = inlined_call_operand.hbm [shape: f32[32,128], index: 2, kind: input, shape index: {}]   ;;  %s822_s3 = inlined_call_operand.hbm [shape: f32[8,512], index: 3, kind: output, shape index: {0}]   ;;  %s823_s4 = inlined_call_operand.hbm [shape: f32[8,512], index: 4, kind: output, shape index: {1}]  }
   0x1   :  { %11 = vsyncpa [#allocation6], 0 }
   0x2   :  { %12 = vsyncpa [#allocation4], 0 }
   0x3   :  { %13 = vsyncpa [#allocation10], 0  ;;  %s709_s15 = smov [#allocation5]   ;;  %s710_s17 = smov [#allocation2]  }
   0x4   :  { %s32_s16 = sshll.u32 %s709_s15, 4  ;;  %s19_s18 = sshll.u32 %s710_s17, 4  ;;  %s33_s16 = int_to_ptr.vmem [resolvable:$true] %s32_s16  ;;  %s744_s18 = int_to_ptr.vmem [resolvable:$true] %s19_s18 }
   0x5   :  { %s591_s21 = scalar_lea.hbm %s820_s1, 512 }
   0x6   :  { %p592_p0 = scmp.ne.s32.totalorder %s820_s1, %s591_s21  ;;  %p595_p1 = scmp.lt.u32.totalorder %s591_s21, %s820_s1 }
   0x8   :  { %p597_p2 = pnand %p595_p1, %p592_p0 }
   0xa   :  { %600 = shalt.err (!%p597_p2)
}
   0xb   :  { %s601_s26 = scalar_lea.vmem %s33_s16, 512  ;;  %p606_p4 = scmp.lt.s32.totalorder %s33_s16, %s33_s16 }
   0xc   :  { %p602_p3 = scmp.ne.s32.totalorder %s33_s16, %s601_s26  ;;  %p607_p5 = scmp.lt.s32.totalorder %s601_s26, %s601_s26 }
   0xe   :  { %p608_p6 = por %p607_p5, %p606_p4 }
  0x10   :  { %p609_p7 = pnand %p608_p6, %p602_p3 }
  0x12   :  { %612 = shalt.err (!%p609_p7)
}
  0x13   :  { %35 = dma.hbm_to_vmem [thread:$0]  %s820_s1, 512, %s33_s16, [#allocation6]  }
  0x14   :  { %s613_s5 = scalar_lea.hbm %s819_s0, 8192 }
  0x15   :  { %p614_p8 = scmp.ne.s32.totalorder %s819_s0, %s613_s5  ;;  %p617_p9 = scmp.lt.u32.totalorder %s613_s5, %s819_s0 }
  0x17   :  { %p619_p10 = pnand %p617_p9, %p614_p8 }
  0x19   :  { %622 = shalt.err (!%p619_p10)
}
  0x1a   :  { %s623_s10 = scalar_lea.vmem %s744_s18, 8192  ;;  %p628_p12 = scmp.lt.s32.totalorder %s744_s18, %s744_s18 }
  0x1b   :  { %p624_p11 = scmp.ne.s32.totalorder %s744_s18, %s623_s10  ;;  %p629_p13 = scmp.lt.s32.totalorder %s623_s10, %s623_s10 }
  0x1d   :  { %p630_p0 = por %p629_p13, %p628_p12 }
  0x1f   :  { %p631_p1 = pnand %p630_p0, %p624_p11 }
  0x21   :  { %634 = shalt.err (!%p631_p1)
}
  0x22   :  { %s711_s1 = smov 512   ;;  %s712_s11 = smov 32  }
  0x23   :  { %25 = dma.hbm_to_vmem [thread:$0]  %s819_s0, 8192, %s744_s18, [#allocation3], %s711_s1, %s711_s1, %s712_s11  }
  0x24   :  { %s713_s14 = smov [#allocation7]   ;;  %s635_s19 = scalar_lea.hbm %s821_s2, 512 }
  0x25   :  { %s41_s15 = sshll.u32 %s713_s14, 4  ;;  %p636_p2 = scmp.ne.s32.totalorder %s821_s2, %s635_s19  ;;  %s42_s15 = int_to_ptr.vmem [resolvable:$true] %s41_s15 }
  0x26   :  { %p639_p3 = scmp.lt.u32.totalorder %s635_s19, %s821_s2 }
  0x28   :  { %p641_p4 = pnand %p639_p3, %p636_p2 }
  0x2a   :  { %644 = shalt.err (!%p641_p4)
}
  0x2b   :  { %s645_s24 = scalar_lea.vmem %s42_s15, 512  ;;  %p650_p6 = scmp.lt.s32.totalorder %s42_s15, %s42_s15 }
  0x2c   :  { %p646_p5 = scmp.ne.s32.totalorder %s42_s15, %s645_s24  ;;  %p651_p7 = scmp.lt.s32.totalorder %s645_s24, %s645_s24 }
  0x2e   :  { %p652_p8 = por %p651_p7, %p650_p6 }
  0x30   :  { %p653_p9 = pnand %p652_p8, %p646_p5 }
  0x32   :  { %656 = shalt.err (!%p653_p9)
}
  0x33   :  { %s714_s0 = smov 128   ;;  %s715_s18 = smov 8  }
  0x34   :  { %47 = dma.hbm_to_vmem [thread:$0]  %s821_s2, 512, %s42_s15, [#allocation6], %s714_s0, %s714_s0, %s715_s18  }
  0x35   :  { %701 = dma.done.wait [#allocation3], 8192  }
  0x36   :  { %702 = vsyncadd [#allocation3], 4294959104 }
  0x37   :  { %703 = dma.done.wait [#allocation6], 1024  }
  0x38   :  { %704 = vsyncadd [#allocation6], 4294966272  ;;  %v716_v0 = vmov 0.0   ;;  %v62_v1 = vld [vmem:[#allocation2 + $0x8] sm:$0xff]  ;;  %v64_v3 = vld [vmem:[#allocation2 + $0x18] sm:$0xff]  ;;  %s717_s2 = smov [#allocation9]  }
  0x39   :  { %189 = vmatprep.mubr.f32.mxu0 %v716_v0  ;;  %278 = vmatprep.mubr.f32.mxu1 %v716_v0  ;;  %v66_v2 = vld [vmem:[#allocation2 + $0x28] sm:$0xff]  ;;  %v68_v5 = vld [vmem:[#allocation2 + $0x38] sm:$0xff]  ;;  %v61_v6 = vld [vmem:[#allocation2] sm:$0xff]  ;;  %s427_s27 = sshll.u32 %s717_s2, 4  ;;  %s428_s27 = int_to_ptr.vmem [resolvable:$true] %s427_s27 }
  0x3a   :  { %v453_v4 = vpack.c.bf16 %v66_v2, %v62_v1  ;;  %v65_v7 = vld [vmem:[#allocation2 + $0x20] sm:$0xff]  ;;  %v485_v8 = vpack.c.bf16 %v68_v5, %v64_v3  ;;  %v63_v10 = vld [vmem:[#allocation2 + $0x10] sm:$0xff]  ;;  %v70_v12 = vld [vmem:[#allocation2 + $0x48] sm:$0xff]  ;;  %s657_s28 = scalar_lea.vmem %s428_s27, 512  ;;  %p662_p11 = scmp.lt.s32.totalorder %s428_s27, %s428_s27 }
  0x3b   :  { %v455_v9 = vpack.c.bf16 %v65_v7, %v61_v6  ;;  %v67_v11 = vld [vmem:[#allocation2 + $0x30] sm:$0xff]  ;;  %v74_v14 = vld [vmem:[#allocation2 + $0x68] sm:$0xff]  ;;  %v72_v15 = vld [vmem:[#allocation2 + $0x58] sm:$0xff]  ;;  %p658_p10 = scmp.ne.s32.totalorder %s428_s27, %s657_s28  ;;  %p663_p12 = scmp.lt.s32.totalorder %s657_s28, %s657_s28 }
  0x3c   :  { %454 = vmatprep.subr.bf16.mxu0 %v453_v4  ;;  %v487_v13 = vpack.c.bf16 %v67_v11, %v63_v10  ;;  %v76_v16 = vld [vmem:[#allocation2 + $0x78] sm:$0xff]  ;;  %486 = vmatprep.subr.bf16.mxu1 %v485_v8  ;;  %v457_v17 = vpack.c.bf16 %v74_v14, %v70_v12  ;;  %v69_v19 = vld [vmem:[#allocation2 + $0x40] sm:$0xff]  ;;  %v71_v21 = vld [vmem:[#allocation2 + $0x50] sm:$0xff] }
  0x3d   :  { %456 = vmatpush1.bf16.msra.mxu0 %v455_v9  ;;  %v489_v18 = vpack.c.bf16 %v76_v16, %v72_v15  ;;  %v73_v20 = vld [vmem:[#allocation2 + $0x60] sm:$0xff]  ;;  %v75_v23 = vld [vmem:[#allocation2 + $0x70] sm:$0xff]  ;;  %v78_v24 = vld [vmem:[#allocation2 + $0x88] sm:$0xff]  ;;  %p664_p13 = por %p663_p12, %p662_p11 }
  0x3e   :  { %488 = vmatpush1.bf16.msra.mxu1 %v487_v13  ;;  %v459_v22 = vpack.c.bf16 %v73_v20, %v69_v19  ;;  %v82_v25 = vld [vmem:[#allocation2 + $0xa8] sm:$0xff]  ;;  %458 = vmatprep.subr.bf16.mxu0 %v457_v17  ;;  %v491_v26 = vpack.c.bf16 %v75_v23, %v71_v21  ;;  %v80_v28 = vld [vmem:[#allocation2 + $0x98] sm:$0xff]  ;;  %v77_v30 = vld [vmem:[#allocation2 + $0x80] sm:$0xff] }
  0x3f   :  { %490 = vmatprep.subr.bf16.mxu1 %v489_v18  ;;  %v461_v27 = vpack.c.bf16 %v82_v25, %v78_v24  ;;  %v84_v29 = vld [vmem:[#allocation2 + $0xb8] sm:$0xff]  ;;  %v81_v32 = vld [vmem:[#allocation2 + $0xa0] sm:$0xff]  ;;  %v79_v33 = vld [vmem:[#allocation2 + $0x90] sm:$0xff]  ;;  %p665_p0 = pnand %p664_p13, %p658_p10 }
  0x40   :  { %v493_v31 = vpack.c.bf16 %v84_v29, %v80_v28  ;;  %v83_v34 = vld [vmem:[#allocation2 + $0xb0] sm:$0xff]  ;;  %v463_v35 = vpack.c.bf16 %v81_v32, %v77_v30  ;;  %v86_v36 = vld [vmem:[#allocation2 + $0xc8] sm:$0xff]  ;;  %v88_v38 = vld [vmem:[#allocation2 + $0xd8] sm:$0xff] }
  0x41   :  { %460 = vmatpush1.bf16.msra.mxu0 %v459_v22  ;;  %v90_v37 = vld [vmem:[#allocation2 + $0xe8] sm:$0xff]  ;;  %v495_v39 = vpack.c.bf16 %v83_v34, %v79_v33  ;;  %v92_v41 = vld [vmem:[#allocation2 + $0xf8] sm:$0xff]  ;;  %v85_v42 = vld [vmem:[#allocation2 + $0xc0] sm:$0xff] }
  0x42   :  { %492 = vmatpush1.bf16.msra.mxu1 %v491_v26  ;;  %462 = vmatprep.subr.bf16.mxu0 %v461_v27  ;;  %v465_v40 = vpack.c.bf16 %v90_v37, %v86_v36  ;;  %v89_v43 = vld [vmem:[#allocation2 + $0xe0] sm:$0xff]  ;;  %v497_v44 = vpack.c.bf16 %v92_v41, %v88_v38  ;;  %v87_v45 = vld [vmem:[#allocation2 + $0xd0] sm:$0xff]  ;;  %v94_v47 = vld [vmem:[#allocation2 + $0x108] sm:$0xff] }
  0x43   :  { %494 = vmatprep.subr.bf16.mxu1 %v493_v31  ;;  %v91_v46 = vld [vmem:[#allocation2 + $0xf0] sm:$0xff]  ;;  %v98_v48 = vld [vmem:[#allocation2 + $0x128] sm:$0xff]  ;;  %v96_v49 = vld [vmem:[#allocation2 + $0x118] sm:$0xff]  ;;  %v467_v51 = vpack.c.bf16 %v89_v43, %v85_v42 }
  0x44   :  { %v100_v50 = vld [vmem:[#allocation2 + $0x138] sm:$0xff]  ;;  %v499_v52 = vpack.c.bf16 %v91_v46, %v87_v45  ;;  %v469_v53 = vpack.c.bf16 %v98_v48, %v94_v47  ;;  %v93_v54 = vld [vmem:[#allocation2 + $0x100] sm:$0xff]  ;;  %v95_v56 = vld [vmem:[#allocation2 + $0x110] sm:$0xff] }
  0x45   :  { %464 = vmatpush1.bf16.msra.mxu0 %v463_v35  ;;  %v97_v55 = vld [vmem:[#allocation2 + $0x120] sm:$0xff]  ;;  %v501_v57 = vpack.c.bf16 %v100_v50, %v96_v49  ;;  %v99_v58 = vld [vmem:[#allocation2 + $0x130] sm:$0xff]  ;;  %v102_v59 = vld [vmem:[#allocation2 + $0x148] sm:$0xff] }
  0x46   :  { %496 = vmatpush1.bf16.msra.mxu1 %v495_v39  ;;  %466 = vmatprep.subr.bf16.mxu0 %v465_v40  ;;  %v106_v60 = vld [vmem:[#allocation2 + $0x168] sm:$0xff]  ;;  %v104_v61 = vld [vmem:[#allocation2 + $0x158] sm:$0xff]  ;;  %v471_v63 = vpack.c.bf16 %v97_v55, %v93_v54  ;;  %v503_v1 = vpack.c.bf16 %v99_v58, %v95_v56  ;;  %v101_v3 = vld [vmem:[#allocation2 + $0x140] sm:$0xff] }
  0x47   :  { %498 = vmatprep.subr.bf16.mxu1 %v497_v44  ;;  %v108_v62 = vld [vmem:[#allocation2 + $0x178] sm:$0xff]  ;;  %v473_v2 = vpack.c.bf16 %v106_v60, %v102_v59  ;;  %v105_v4 = vld [vmem:[#allocation2 + $0x160] sm:$0xff]  ;;  %v103_v5 = vld [vmem:[#allocation2 + $0x150] sm:$0xff] }
  0x48   :  { %v505_v6 = vpack.c.bf16 %v108_v62, %v104_v61  ;;  %v107_v7 = vld [vmem:[#allocation2 + $0x170] sm:$0xff]  ;;  %v110_v8 = vld [vmem:[#allocation2 + $0x188] sm:$0xff]  ;;  %v112_v10 = vld [vmem:[#allocation2 + $0x198] sm:$0xff]  ;;  %v475_v12 = vpack.c.bf16 %v105_v4, %v101_v3 }
  0x49   :  { %468 = vmatpush1.bf16.msra.mxu0 %v467_v51  ;;  %v114_v9 = vld [vmem:[#allocation2 + $0x1a8] sm:$0xff]  ;;  %v116_v11 = vld [vmem:[#allocation2 + $0x1b8] sm:$0xff]  ;;  %v507_v13 = vpack.c.bf16 %v107_v7, %v103_v5  ;;  %v109_v15 = vld [vmem:[#allocation2 + $0x180] sm:$0xff] }
  0x4a   :  { %500 = vmatpush1.bf16.msra.mxu1 %v499_v52  ;;  %470 = vmatprep.subr.bf16.mxu0 %v469_v53  ;;  %v477_v14 = vpack.c.bf16 %v114_v9, %v110_v8  ;;  %v113_v16 = vld [vmem:[#allocation2 + $0x1a0] sm:$0xff]  ;;  %v111_v17 = vld [vmem:[#allocation2 + $0x190] sm:$0xff]  ;;  %v509_v18 = vpack.c.bf16 %v116_v11, %v112_v10  ;;  %v118_v20 = vld [vmem:[#allocation2 + $0x1c8] sm:$0xff] }
  0x4b   :  { %502 = vmatprep.subr.bf16.mxu1 %v501_v57  ;;  %v115_v19 = vld [vmem:[#allocation2 + $0x1b0] sm:$0xff]  ;;  %v122_v21 = vld [vmem:[#allocation2 + $0x1e8] sm:$0xff]  ;;  %v120_v22 = vld [vmem:[#allocation2 + $0x1d8] sm:$0xff]  ;;  %v479_v24 = vpack.c.bf16 %v113_v16, %v109_v15 }
  0x4c   :  { %v124_v23 = vld [vmem:[#allocation2 + $0x1f8] sm:$0xff]  ;;  %v511_v25 = vpack.c.bf16 %v115_v19, %v111_v17  ;;  %v481_v26 = vpack.c.bf16 %v122_v21, %v118_v20  ;;  %v117_v27 = vld [vmem:[#allocation2 + $0x1c0] sm:$0xff]  ;;  %v119_v30 = vld [vmem:[#allocation2 + $0x1d0] sm:$0xff] }
  0x4d   :  { %472 = vmatpush1.bf16.msra.mxu0 %v471_v63  ;;  %v121_v28 = vld [vmem:[#allocation2 + $0x1e0] sm:$0xff]  ;;  %v513_v29 = vpack.c.bf16 %v124_v23, %v120_v22  ;;  %v123_v31 = vld [vmem:[#allocation2 + $0x1f0] sm:$0xff]  ;;  %v58_v35 = vld [vmem:[#allocation7 + $0x8] sm:$0xff] }
  0x4e   :  { %504 = vmatpush1.bf16.msra.mxu1 %v503_v1  ;;  %474 = vmatprep.subr.bf16.mxu0 %v473_v2  ;;  %v483_v32 = vpack.c.bf16 %v121_v28, %v117_v27  ;;  %v515_v33 = vpack.c.bf16 %v123_v31, %v119_v30  ;;  %v57_v34 = vld [vmem:[#allocation7] sm:$0xff]  ;;  %v59_v36 = vld [vmem:[#allocation7 + $0x10] sm:$0xff]  ;;  %v60_v37 = vld [vmem:[#allocation7 + $0x18] sm:$0xff] }
  0x4f   :  { %506 = vmatprep.subr.bf16.mxu1 %v505_v6  ;;  %v379_v23 = vld [vmem:[#allocation5] sm:$0xff] }
  0x51   :  { %476 = vmatpush1.bf16.msra.mxu0 %v475_v12 }
  0x52   :  { %508 = vmatpush1.bf16.msra.mxu1 %v507_v13  ;;  %478 = vmatprep.subr.bf16.mxu0 %v477_v14 }
  0x53   :  { %510 = vmatprep.subr.bf16.mxu1 %v509_v18 }
  0x55   :  { %480 = vmatpush1.bf16.msra.mxu0 %v479_v24 }
  0x56   :  { %512 = vmatpush1.bf16.msra.mxu1 %v511_v25  ;;  %482 = vmatprep.subr.bf16.mxu0 %v481_v26 }
  0x57   :  { %514 = vmatprep.subr.bf16.mxu1 %v513_v29 }
  0x59   :  { %484 = vmatpush1.bf16.msra.mxu0 %v483_v32 }
  0x5a   :  { %516 = vmatpush1.bf16.msra.mxu1 %v515_v33  ;;  %v381_v33 = vld [vmem:[#allocation5 + $0x10] sm:$0xff] }
  0x5c   :  { %190 = vmatmul.mubr.f32.vlgmr.msra.gmra.mrb[0].mxu0 %v57_v34 }
  0x5d   :  { %279 = vmatmul.mubr.f32.vlgmr.msra.gmra.mrb[0].mxu1 %v57_v34  ;;  %195 = vmatprep.mubr.f32.mxu0 %v716_v0 }
  0x5e   :  { %284 = vmatprep.mubr.f32.mxu1 %v716_v0 }
  0x60   :  { %196 = vmatmul.mubr.f32.gmra.mrb[2].mxu0 %v58_v35 }
  0x61   :  { %285 = vmatmul.mubr.f32.gmra.mrb[2].mxu1 %v58_v35  ;;  %201 = vmatprep.mubr.f32.mxu0 %v716_v0  ;;  %v380_v35 = vld [vmem:[#allocation5 + $0x8] sm:$0xff] }
  0x62   :  { %290 = vmatprep.mubr.f32.mxu1 %v716_v0 }
  0x64   :  { %202 = vmatmul.mubr.f32.gmra.mrb[4].mxu0 %v59_v36 }
  0x65   :  { %291 = vmatmul.mubr.f32.gmra.mrb[4].mxu1 %v59_v36  ;;  %207 = vmatprep.mubr.f32.mxu0 %v716_v0 }
  0x66   :  { %296 = vmatprep.mubr.f32.mxu1 %v716_v0 }
  0x68   :  { %208 = vmatmul.mubr.f32.gmra.mrb[6].mxu0 %v60_v37 }
  0x69   :  { %297 = vmatmul.mubr.f32.gmra.mrb[6].mxu1 %v60_v37 }
 0x12f   :  { %v191_v38 = vpop.f32.mrb[0].mxu0 }
 0x130   :  { %v441_v39 = vmul.f32 -1.442695, %v191_v38  ;;  %v280_v40 = vpop.f32.mrb[0].mxu1  ;;  %v193_v41 = vpop.f32.mrb[1].mxu0  ;;  %v382_v38 = vld [vmem:[#allocation5 + $0x18] sm:$0xff] }
 0x131   :  { %v443_v42 = vmul.f32 -1.442695, %v280_v40  ;;  %v442_v43 = vmul.f32 -1.442695, %v193_v41  ;;  %v282_v44 = vpop.f32.mrb[1].mxu1 }
 0x132   :  { %527 = vpow2.f32 %v441_v39  ;;  %v444_v45 = vmul.f32 -1.442695, %v282_v44 }
 0x133   :  { %529 = vpow2.f32 %v443_v42  ;;  %v197_v46 = vpop.f32.mrb[2].mxu0 }
 0x134   :  { %531 = vpow2.f32 %v442_v43  ;;  %v445_v47 = vmul.f32 -1.442695, %v197_v46  ;;  %v286_v48 = vpop.f32.mrb[2].mxu1  ;;  %v199_v49 = vpop.f32.mrb[3].mxu0 }
 0x135   :  { %533 = vpow2.f32 %v444_v45  ;;  %v447_v50 = vmul.f32 -1.442695, %v286_v48  ;;  %v446_v0 = vmul.f32 -1.442695, %v199_v49  ;;  %v288_v51 = vpop.f32.mrb[3].mxu1 }
 0x136   :  { %535 = vpow2.f32 %v445_v47  ;;  %v448_v52 = vmul.f32 -1.442695, %v288_v51 }
 0x137   :  { %537 = vpow2.f32 %v447_v50  ;;  %v203_v53 = vpop.f32.mrb[4].mxu0 }
 0x138   :  { %539 = vpow2.f32 %v446_v0  ;;  %v292_v54 = vpop.f32.mrb[4].mxu1  ;;  %v205_v55 = vpop.f32.mrb[5].mxu0  ;;  %v449_v59 = vmul.f32 -1.442695, %v203_v53 }
 0x139   :  { %541 = vpow2.f32 %v448_v52  ;;  %v294_v56 = vpop.f32.mrb[5].mxu1  ;;  %v451_v1 = vmul.f32 -1.442695, %v292_v54  ;;  %v450_v4 = vmul.f32 -1.442695, %v205_v55 }
 0x13a   :  { %v452_v7 = vmul.f32 -1.442695, %v294_v56 }
 0x13b   :  { %v209_v57 = vpop.f32.mrb[6].mxu0 }
 0x13c   :  { %v528_v58 = vpop.eup %527  ;;  %v298_v60 = vpop.f32.mrb[6].mxu1  ;;  %543 = vtanh.f32 %v209_v57 }
 0x13d   :  { %v211_v61 = vpop.f32.mrb[7].mxu0  ;;  %v530_v62 = vpop.eup %529  ;;  %v315_v63 = vadd.f32 1.0, %v528_v58 }
 0x13e   :  { %v300_v2 = vpop.f32.mrb[7].mxu1  ;;  %v532_v3 = vpop.eup %531  ;;  %v317_v9 = vadd.f32 1.0, %v530_v62 }
 0x13f   :  { %v534_v5 = vpop.eup %533  ;;  %545 = vrcp.f32 %v315_v63  ;;  %v316_v12 = vadd.f32 1.0, %v532_v3 }
 0x140   :  { %v536_v6 = vpop.eup %535  ;;  %547 = vpow2.f32 %v449_v59  ;;  %v318_v17 = vadd.f32 1.0, %v534_v5 }
 0x141   :  { %v538_v8 = vpop.eup %537  ;;  %v339_v10 = vadd.f32 1.0, %v536_v6  ;;  %549 = vpow2.f32 %v451_v1 }
 0x142   :  { %v540_v11 = vpop.eup %539  ;;  %551 = vpow2.f32 %v450_v4  ;;  %v341_v14 = vadd.f32 1.0, %v538_v8 }
 0x143   :  { %v542_v13 = vpop.eup %541  ;;  %553 = vrcp.f32 %v339_v10  ;;  %v340_v15 = vadd.f32 1.0, %v540_v11 }
 0x144   :  { %555 = vpow2.f32 %v452_v7  ;;  %v342_v16 = vadd.f32 1.0, %v542_v13 }
 0x145   :  { %557 = vrcp.f32 %v317_v9 }
 0x146   :  { %559 = vrcp.f32 %v316_v12  ;;  %v544_v18 = vpop.eup %543 }
 0x147   :  { %561 = vrcp.f32 %v341_v14 }
 0x148   :  { %563 = vrcp.f32 %v340_v15 }
 0x149   :  { %v546_v19 = vpop.eup %545  ;;  %565 = vrcp.f32 %v342_v16 }
 0x14a   :  { %v548_v20 = vpop.eup %547  ;;  %567 = vrcp.f32 %v318_v17  ;;  %v387_v21 = vmul.f32 %v546_v19, %v544_v18 }
 0x14b   :  { %v550_v22 = vpop.eup %549  ;;  %569 = vtanh.f32 %v298_v60  ;;  %v363_v26 = vadd.f32 1.0, %v548_v20 }
 0x14c   :  { %v552_v24 = vpop.eup %551  ;;  %571 = vtanh.f32 %v211_v61  ;;  %v365_v37 = vadd.f32 1.0, %v550_v22 }
 0x14d   :  { %v554_v25 = vpop.eup %553  ;;  %573 = vtanh.f32 %v300_v2  ;;  %v364_v41 = vadd.f32 1.0, %v552_v24 }
 0x14e   :  { %v556_v27 = vpop.eup %555  ;;  %v383_v28 = vmul.f32 %v554_v25, %v379_v23  ;;  %575 = vrcp.f32 %v363_v26 }
 0x14f   :  { %v558_v29 = vpop.eup %557  ;;  %v366_v43 = vadd.f32 1.0, %v556_v27 }
 0x150   :  { %v560_v30 = vpop.eup %559  ;;  %v391_v31 = vadd.f32 %v387_v21, %v383_v28 }
 0x151   :  { %v562_v32 = vpop.eup %561 }
 0x152   :  { %v564_v34 = vpop.eup %563  ;;  %577 = vtanh.f32 %v391_v31  ;;  %407 = vst [vmem:[#allocation9] sm:$0xff] %v391_v31  ;;  %v385_v40 = vmul.f32 %v562_v32, %v381_v33 }
 0x153   :  { %v566_v36 = vpop.eup %565  ;;  %v384_v44 = vmul.f32 %v564_v34, %v380_v35  ;;  %579 = vrcp.f32 %v365_v37 }
 0x154   :  { %v568_v39 = vpop.eup %567  ;;  %v386_v47 = vmul.f32 %v566_v36, %v382_v38  ;;  %581 = vrcp.f32 %v364_v41 }
 0x155   :  { %v570_v42 = vpop.eup %569  ;;  %583 = vrcp.f32 %v366_v43 }
 0x156   :  { %v572_v45 = vpop.eup %571  ;;  %v389_v46 = vmul.f32 %v570_v42, %v558_v29 }
 0x157   :  { %v574_v48 = vpop.eup %573  ;;  %v388_v49 = vmul.f32 %v572_v45, %v560_v30 }
 0x158   :  { %v393_v50 = vadd.f32 %v389_v46, %v385_v40  ;;  %v390_v0 = vmul.f32 %v574_v48, %v568_v39  ;;  %v576_v53 = vpop.eup %575 }
 0x159   :  { %v392_v51 = vadd.f32 %v388_v49, %v384_v44 }
 0x15a   :  { %585 = vtanh.f32 %v393_v50  ;;  %409 = vst [vmem:[#allocation9 + $0x10] sm:$0xff] %v393_v50  ;;  %v394_v52 = vadd.f32 %v390_v0, %v386_v47 }
 0x15b   :  { %587 = vtanh.f32 %v392_v51  ;;  %408 = vst [vmem:[#allocation9 + $0x8] sm:$0xff] %v392_v51 }
 0x15c   :  { %v578_v54 = vpop.eup %577  ;;  %589 = vtanh.f32 %v394_v52  ;;  %410 = vst [vmem:[#allocation9 + $0x18] sm:$0xff] %v394_v52 }
 0x15d   :  { %v399_v55 = vmul.f32 %v578_v54, %v576_v53 }
 0x15e   :  { %668 = shalt.err (!%p665_p0)
}
 0x15f   :  { %s669_s5 = scalar_lea.hbm %s823_s4, 512 }
 0x160   :  { %p670_p1 = scmp.ne.s32.totalorder %s823_s4, %s669_s5  ;;  %p673_p2 = scmp.lt.u32.totalorder %s669_s5, %s823_s4 }
 0x162   :  { %p675_p3 = pnand %p673_p2, %p670_p1 }
 0x164   :  { %678 = shalt.err (!%p675_p3)
}
 0x165   :  { %430 = dma.vmem_to_hbm [thread:$0]  %s428_s27, 512, %s823_s4, [#allocation10]   ;;  %403 = vst [vmem:[#allocation8] sm:$0xff] %v399_v55  ;;  %v580_v56 = vpop.eup %579 }
 0x166   :  { %v582_v57 = vpop.eup %581  ;;  %s718_s11 = smov [#allocation8]  }
 0x167   :  { %v584_v58 = vpop.eup %583  ;;  %s417_s12 = sshll.u32 %s718_s11, 4  ;;  %s418_s12 = int_to_ptr.vmem [resolvable:$true] %s417_s12 }
 0x168   :  { %v586_v59 = vpop.eup %585  ;;  %s679_s13 = scalar_lea.vmem %s418_s12, 512  ;;  %p684_p5 = scmp.lt.s32.totalorder %s418_s12, %s418_s12 }
 0x169   :  { %v588_v60 = vpop.eup %587  ;;  %v401_v61 = vmul.f32 %v586_v59, %v580_v56  ;;  %p680_p4 = scmp.ne.s32.totalorder %s418_s12, %s679_s13  ;;  %p685_p6 = scmp.lt.s32.totalorder %s679_s13, %s679_s13 }
 0x16a   :  { %v590_v62 = vpop.eup %589  ;;  %v400_v63 = vmul.f32 %v588_v60, %v582_v57 }
 0x16b   :  { %v402_v1 = vmul.f32 %v590_v62, %v584_v58  ;;  %405 = vst [vmem:[#allocation8 + $0x10] sm:$0xff] %v401_v61  ;;  %p686_p7 = por %p685_p6, %p684_p5 }
 0x16c   :  { %404 = vst [vmem:[#allocation8 + $0x8] sm:$0xff] %v400_v63 }
 0x16d   :  { %406 = vst [vmem:[#allocation8 + $0x18] sm:$0xff] %v402_v1  ;;  %p687_p8 = pnand %p686_p7, %p680_p4 }
 0x16f   :  { %690 = shalt.err (!%p687_p8)
}
 0x170   :  { %s691_s15 = scalar_lea.hbm %s822_s3, 512 }
 0x171   :  { %p692_p9 = scmp.ne.s32.totalorder %s822_s3, %s691_s15  ;;  %p695_p10 = scmp.lt.u32.totalorder %s691_s15, %s822_s3 }
 0x173   :  { %p697_p11 = pnand %p695_p10, %p692_p9 }
 0x175   :  { %700 = shalt.err (!%p697_p11)
}
 0x176   :  { %420 = dma.vmem_to_hbm [thread:$0]  %s418_s12, 512, %s822_s3, [#allocation4]  }
 0x177   :  { %705 = dma.done.wait [#allocation4], 512  }
 0x178   :  { %706 = vsyncadd [#allocation4], 4294966784 }
 0x179   :  { %707 = dma.done.wait [#allocation10], 512  }
 0x17a   :  { %708 = vsyncadd [#allocation10], 4294966784 }
 0x17b   :  { %437 = vsyncpa [#allocation3], 1 }
 0x17c   :  { %438 = vsyncpa [#allocation6], 1 }
 0x17d   :  { %439 = vsyncpa [#allocation4], 1 }
 0x17e   :  { %440 = vsyncpa [#allocation10], 1 }

</bundles_post_ra>
